<compile_context>
chip_gen: v5e
topology: v5e:2x2
jax: 0.10.0
libtpu: 0.0.40
codegen_flags: <defaults>
</compile_context>

<pallas_src>
import math

import jax
import jax.numpy as jnp
from jax.experimental import pallas as pl
from jax.experimental.pallas import tpu as pltpu

LANE_PAD = 128  # pad output feature dims to full lane width


def _gcn2_fused_kernel(a_ref, x_ref, w1_ref, b1_ref, w2_ref, b2_ref, o_ref):
    """Fused 2-layer GCN.

    a_ref : [N, N]      bf16   normalized adjacency (dense stand-in for torch.sparse.mm)
    x_ref : [N, F_in]   bf16   node features
    w1_ref: [F_in, 128] bf16   layer-1 weight, zero-padded from F_hidden=16 to 128
    b1_ref: [1, 128]    f32    layer-1 bias, zero-padded
    w2_ref: [128, 128]  bf16   layer-2 weight, zero-padded from (16, 7)
    b2_ref: [1, 128]    f32    layer-2 bias, zero-padded
    o_ref : [N, 128]    f32    padded logits (valid columns [:, :num_classes])
    """
    a = a_ref[...]
    x = x_ref[...]

    # ---- layer 1: h = relu(A @ (X @ W1) + b1) ----
    support1 = jnp.dot(x, w1_ref[...], preferred_element_type=jnp.float32)        # [N, 128] f32
    h = jnp.dot(a, support1.astype(jnp.bfloat16), preferred_element_type=jnp.float32)
    h = jnp.maximum(h + b1_ref[...], 0.0)                                          # f32 epilogue (VPU)

    # ---- layer 2: logits = A @ (h @ W2) + b2 ----
    support2 = jnp.dot(h.astype(jnp.bfloat16), w2_ref[...],
                       preferred_element_type=jnp.float32)                         # [N, 128] f32
    out = jnp.dot(a, support2.astype(jnp.bfloat16), preferred_element_type=jnp.float32)
    out = out + b2_ref[...]

    o_ref[...] = out.astype(o_ref.dtype)


@jax.jit
def gcn_net_forward(adjacency, feature, params):
    """GcnNet.forward: h = relu(gcn1(A, X)); logits = gcn2(A, h)."""
    w1, b1, w2, b2 = params
    n = adjacency.shape[0]
    f_in, hidden = w1.shape
    num_classes = w2.shape[1]

    # Zero-pad output feature dims to 128 lanes (free zeros through the MXU).
    w1p = jnp.pad(w1, ((0, 0), (0, LANE_PAD - hidden))).astype(jnp.bfloat16)            # [F_in, 128]
    b1p = jnp.pad(b1.reshape(1, hidden), ((0, 0), (0, LANE_PAD - hidden)))               # [1, 128] f32
    w2p = jnp.pad(w2, ((0, LANE_PAD - hidden), (0, LANE_PAD - num_classes))).astype(jnp.bfloat16)
    b2p = jnp.pad(b2.reshape(1, num_classes), ((0, 0), (0, LANE_PAD - num_classes)))     # [1, 128] f32

    a_bf = adjacency.astype(jnp.bfloat16)
    x_bf = feature.astype(jnp.bfloat16)

    vmem_spec = pl.BlockSpec(memory_space=pltpu.MemorySpace.VMEM)
    out_padded = pl.pallas_call(
        _gcn2_fused_kernel,
        out_shape=jax.ShapeDtypeStruct((n, LANE_PAD), jnp.float32),
        in_specs=[vmem_spec] * 6,     # whole arrays resident in VMEM, no grid / pipeline overhead
        out_specs=vmem_spec,
    )(a_bf, x_bf, w1p, b1p, w2p, b2p)

    return out_padded[:, :num_classes]


def kaiming_uniform(key, shape):
    """Mimics torch.nn.init.kaiming_uniform_ (a=0, fan_in = shape[1] for 2D tensors)."""
    fan_in = shape[1]
    gain = math.sqrt(2.0)
    bound = gain * math.sqrt(3.0 / fan_in)
    return jax.random.uniform(key, shape, minval=-bound, maxval=bound, dtype=jnp.float32)


if __name__ == "__main__":
    # Small, module-consistent shapes: N nodes, input_dim features, hidden=16, classes=7.
    N = 128
    INPUT_DIM = 128
    HIDDEN = 16
    NUM_CLASSES = 7

    key = jax.random.PRNGKey(0)
    k_adj, k_x, k_w1, k_w2 = jax.random.split(key, 4)

    # Deterministic synthetic normalized adjacency (dense stand-in for torch.sparse).
    raw = (jax.random.uniform(k_adj, (N, N)) > 0.9).astype(jnp.float32)
    adj = jnp.maximum(raw, raw.T) + jnp.eye(N, dtype=jnp.float32)
    deg = jnp.sum(adj, axis=1, keepdims=True)
    adjacency = adj / jnp.sqrt(deg) / jnp.sqrt(deg.T)  # D^-1/2 A D^-1/2

    feature = jax.random.normal(k_x, (N, INPUT_DIM), dtype=jnp.float32)

    # Parameters (GraphConvolution.reset_parameters: kaiming_uniform weight, zero bias).
    w1 = kaiming_uniform(k_w1, (INPUT_DIM, HIDDEN))
    b1 = jnp.zeros((HIDDEN,), dtype=jnp.float32)
    w2 = kaiming_uniform(k_w2, (HIDDEN, NUM_CLASSES))
    b2 = jnp.zeros((NUM_CLASSES,), dtype=jnp.float32)
    params = (w1, b1, w2, b2)

    logits = gcn_net_forward(adjacency, feature, params)
    logits = jax.block_until_ready(logits)

    # Reference check in plain f32 JAX (kernel uses bf16 MXU inputs with f32 accumulation,
    # so a looser tolerance than pure-f32 is expected).
    h_ref = jnp.maximum(adjacency @ (feature @ w1) + b1, 0.0)
    logits_ref = adjacency @ (h_ref @ w2) + b2
    assert logits.shape == (N, NUM_CLASSES)
    assert jnp.allclose(logits, logits_ref, atol=5e-2, rtol=5e-2), float(
        jnp.max(jnp.abs(logits - logits_ref))
    )

    print("KERNEL_OK")
</pallas_src>

<mosaic_0001>
module attributes {stable_mosaic.version = 11 : i64} {
  func.func @_gcn2_fused_kernel(%arg0: memref<128x128xbf16, #tpu.memory_space<vmem>>, %arg1: memref<128x128xbf16, #tpu.memory_space<vmem>>, %arg2: memref<128x128xbf16, #tpu.memory_space<vmem>>, %arg3: memref<1x128xf32, #tpu.memory_space<vmem>>, %arg4: memref<128x128xbf16, #tpu.memory_space<vmem>>, %arg5: memref<1x128xf32, #tpu.memory_space<vmem>>, %arg6: memref<128x128xf32, #tpu.memory_space<vmem>>) attributes {dimension_semantics = [], scalar_prefetch = 0 : i64, scratch_operands = 0 : i64, tpu.core_type = #tpu.core_type<tc>} {
    %c0 = arith.constant 0 : index
    %c0_0 = arith.constant 0 : index
    %0 = vector.load %arg0[%c0, %c0_0] : memref<128x128xbf16, #tpu.memory_space<vmem>>, vector<128x128xbf16>
    %c0_1 = arith.constant 0 : index
    %c0_2 = arith.constant 0 : index
    %1 = vector.load %arg1[%c0_1, %c0_2] : memref<128x128xbf16, #tpu.memory_space<vmem>>, vector<128x128xbf16>
    %c0_3 = arith.constant 0 : index
    %c0_4 = arith.constant 0 : index
    %2 = vector.load %arg2[%c0_3, %c0_4] : memref<128x128xbf16, #tpu.memory_space<vmem>>, vector<128x128xbf16>
    %cst = arith.constant dense<0.000000e+00> : vector<128x128xf32>
    %3 = tpu.matmul %1, %2, %cst {dimension_numbers = #tpu.dot_dimension_numbers<[1], [0], [0], [1], [0, 0, 1, 1], [], []>} : vector<128x128xbf16>, vector<128x128xbf16>, vector<128x128xf32> -> vector<128x128xf32>
    %4 = arith.truncf %3 : vector<128x128xf32> to vector<128x128xbf16>
    %cst_5 = arith.constant dense<0.000000e+00> : vector<128x128xf32>
    %5 = tpu.matmul %0, %4, %cst_5 {dimension_numbers = #tpu.dot_dimension_numbers<[1], [0], [0], [1], [0, 0, 1, 1], [], []>} : vector<128x128xbf16>, vector<128x128xbf16>, vector<128x128xf32> -> vector<128x128xf32>
    %c0_6 = arith.constant 0 : index
    %c0_7 = arith.constant 0 : index
    %6 = vector.load %arg3[%c0_6, %c0_7] : memref<1x128xf32, #tpu.memory_space<vmem>>, vector<1x128xf32>
    %7 = vector.broadcast %6 : vector<1x128xf32> to vector<128x128xf32>
    %8 = arith.addf %5, %7 : vector<128x128xf32>
    %cst_8 = arith.constant 0.000000e+00 : f32
    %9 = vector.broadcast %cst_8 : f32 to vector<128x128xf32>
    %10 = arith.maximumf %8, %9 : vector<128x128xf32>
    %11 = arith.truncf %10 : vector<128x128xf32> to vector<128x128xbf16>
    %c0_9 = arith.constant 0 : index
    %c0_10 = arith.constant 0 : index
    %12 = vector.load %arg4[%c0_9, %c0_10] : memref<128x128xbf16, #tpu.memory_space<vmem>>, vector<128x128xbf16>
    %cst_11 = arith.constant dense<0.000000e+00> : vector<128x128xf32>
    %13 = tpu.matmul %11, %12, %cst_11 {dimension_numbers = #tpu.dot_dimension_numbers<[1], [0], [0], [1], [0, 0, 1, 1], [], []>} : vector<128x128xbf16>, vector<128x128xbf16>, vector<128x128xf32> -> vector<128x128xf32>
    %14 = arith.truncf %13 : vector<128x128xf32> to vector<128x128xbf16>
    %cst_12 = arith.constant dense<0.000000e+00> : vector<128x128xf32>
    %15 = tpu.matmul %0, %14, %cst_12 {dimension_numbers = #tpu.dot_dimension_numbers<[1], [0], [0], [1], [0, 0, 1, 1], [], []>} : vector<128x128xbf16>, vector<128x128xbf16>, vector<128x128xf32> -> vector<128x128xf32>
    %c0_13 = arith.constant 0 : index
    %c0_14 = arith.constant 0 : index
    %16 = vector.load %arg5[%c0_13, %c0_14] : memref<1x128xf32, #tpu.memory_space<vmem>>, vector<1x128xf32>
    %17 = vector.broadcast %16 : vector<1x128xf32> to vector<128x128xf32>
    %18 = arith.addf %15, %17 : vector<128x128xf32>
    %c0_15 = arith.constant 0 : index
    %c0_16 = arith.constant 0 : index
    %19 = vector.load %arg6[%c0_15, %c0_16] : memref<128x128xf32, #tpu.memory_space<vmem>>, vector<128x128xf32>
    tpu.vector_store %arg6[%c0_15, %c0_16], %18 {strides = array<i32>} : memref<128x128xf32, #tpu.memory_space<vmem>>, vector<128x128xf32>,
    return
  }
}

</mosaic_0001>

<bundles_post_ra>
// kernel: gcn_net_forward.1
= control target key start
LH: loop header
LB: loop body
LE: loop exit
PB: predicated region body
PF: predicated region fallthrough
CT: control target
= control target key end

     0   :  { %s922_s2 = inlined_call_operand.vmem [shape: bf16[128,128], index: 2, kind: input, shape index: {}]   ;;  %s923_s1 = inlined_call_operand.vmem [shape: bf16[128,128], index: 1, kind: input, shape index: {}]   ;;  %s924_s3 = inlined_call_operand.vmem [shape: f32[1,128], index: 3, kind: input, shape index: {}]   ;;  %s925_s0 = inlined_call_operand.vmem [shape: bf16[128,128], index: 0, kind: input, shape index: {}]   ;;  %s926_s4 = inlined_call_operand.vmem [shape: bf16[128,128], index: 4, kind: input, shape index: {}]   ;;  %s927_s5 = inlined_call_operand.vmem [shape: f32[1,128], index: 5, kind: input, shape index: {}]   ;;  %s928_s6 = inlined_call_operand.vmem [shape: f32[128,128], index: 6, kind: output, shape index: {}]  }
   0x1   :  { %v694_v0 = vld [vmem:[%s922_s2 + $0x38] sm:$0xff]  ;;  %v693_v1 = vld [vmem:[%s922_s2 + $0x30] sm:$0xff]  ;;  %v692_v2 = vld [vmem:[%s922_s2 + $0x28] sm:$0xff] }
   0x2   :  { %167 = vmatpush.bf16.msra.mxu0 %v694_v0  ;;  %v691_v3 = vld [vmem:[%s922_s2 + $0x20] sm:$0xff]  ;;  %v690_v4 = vld [vmem:[%s922_s2 + $0x18] sm:$0xff]  ;;  %v689_v5 = vld [vmem:[%s922_s2 + $0x10] sm:$0xff] }
   0x3   :  { %v688_v6 = vld [vmem:[%s922_s2 + $0x8] sm:$0xff]  ;;  %v687_v7 = vld [vmem:[%s922_s2] sm:$0xff]  ;;  %v681_v10 = vld [vmem:[%s923_s1 + $0x10] sm:$0xff] }
   0x4   :  { %v679_v8 = vld [vmem:[%s923_s1] sm:$0xff]  ;;  %v680_v9 = vld [vmem:[%s923_s1 + $0x8] sm:$0xff]  ;;  %v682_v11 = vld [vmem:[%s923_s1 + $0x18] sm:$0xff] }
   0x5   :  { %v683_v12 = vld [vmem:[%s923_s1 + $0x20] sm:$0xff]  ;;  %v684_v13 = vld [vmem:[%s923_s1 + $0x28] sm:$0xff]  ;;  %v685_v14 = vld [vmem:[%s923_s1 + $0x30] sm:$0xff] }
   0x6   :  { %168 = vmatpush.bf16.msra.mxu0 %v693_v1  ;;  %v686_v15 = vld [vmem:[%s923_s1 + $0x38] sm:$0xff]  ;;  %v791_v40 = vld [vmem:[%s925_s0] sm:$0xff]  ;;  %v797_v41 = vld [vmem:[%s925_s0 + $0x8] sm:$0xff] }
   0x7   :  { %v803_v42 = vld [vmem:[%s925_s0 + $0x10] sm:$0xff]  ;;  %v809_v43 = vld [vmem:[%s925_s0 + $0x18] sm:$0xff]  ;;  %v815_v44 = vld [vmem:[%s925_s0 + $0x20] sm:$0xff] }
   0x8   :  { %v702_v45 = vld [vmem:[%s926_s4 + $0x38] sm:$0xff]  ;;  %v824_v46 = vld [vmem:[%s925_s0 + $0x28] sm:$0xff]  ;;  %v701_v47 = vld [vmem:[%s926_s4 + $0x30] sm:$0xff] }
   0x9   :  { %413 = vmatpush.bf16.msra.mxu2 %v702_v45  ;;  %v700_v48 = vld [vmem:[%s926_s4 + $0x28] sm:$0xff]  ;;  %v699_v49 = vld [vmem:[%s926_s4 + $0x20] sm:$0xff]  ;;  %v698_v50 = vld [vmem:[%s926_s4 + $0x18] sm:$0xff] }
   0xa   :  { %169 = vmatpush.bf16.msra.mxu0 %v692_v2  ;;  %v842_v51 = vld [vmem:[%s925_s0 + $0x30] sm:$0xff]  ;;  %v696_v53 = vld [vmem:[%s926_s4 + $0x8] sm:$0xff]  ;;  %v695_v54 = vld [vmem:[%s926_s4] sm:$0xff] }
   0xb   :  { %v697_v52 = vld [vmem:[%s926_s4 + $0x10] sm:$0xff]  ;;  %v857_v55 = vld [vmem:[%s925_s0 + $0x38] sm:$0xff]  ;;  %v703_v57 = vld [vmem:[%s924_s3] ss:$0 sm:$0xff] }
   0xd   :  { %414 = vmatpush.bf16.msra.mxu2 %v701_v47 }
   0xe   :  { %170 = vmatpush.bf16.msra.mxu0 %v691_v3 }
  0x11   :  { %415 = vmatpush.bf16.msra.mxu2 %v700_v48 }
  0x12   :  { %171 = vmatpush.bf16.msra.mxu0 %v690_v4 }
  0x15   :  { %416 = vmatpush.bf16.msra.mxu2 %v699_v49 }
  0x16   :  { %172 = vmatpush.bf16.msra.mxu0 %v689_v5 }
  0x19   :  { %417 = vmatpush.bf16.msra.mxu2 %v698_v50 }
  0x1a   :  { %173 = vmatpush.bf16.msra.mxu0 %v688_v6 }
  0x1d   :  { %418 = vmatpush.bf16.msra.mxu2 %v697_v52 }
  0x1e   :  { %174 = vmatpush.bf16.msra.mxu0 %v687_v7 }
  0x21   :  { %175 = vmatmul.bf16.vlgmr.msra.gmra.mxu0 %v679_v8  ;;  %419 = vmatpush.bf16.msra.mxu2 %v696_v53 }
  0x25   :  { %420 = vmatpush.bf16.msra.mxu2 %v695_v54 }
  0x31   :  { %180 = vmatmul.bf16.gmra.mxu0 %v680_v9 }
  0x41   :  { %185 = vmatmul.bf16.gmra.mxu0 %v681_v10 }
  0x51   :  { %190 = vmatmul.bf16.gmra.mxu0 %v682_v11 }
  0x61   :  { %195 = vmatmul.bf16.gmra.mxu0 %v683_v12 }
  0x71   :  { %200 = vmatmul.bf16.gmra.mxu0 %v684_v13 }
  0x81   :  { %205 = vmatmul.bf16.gmra.mxu0 %v685_v14 }
  0x91   :  { %210 = vmatmul.bf16.gmra.mxu0 %v686_v15 }
  0x9e   :  { %v176_v16 = vpop.f32.mrf.mxu0 }
  0xa6   :  { %v178_v17 = vpop.f32.mrf.mxu0 }
  0xa7   :  { %v216_v18 = vpack.c.bf16 %v178_v17, %v176_v16 }
  0xae   :  { %v181_v19 = vpop.f32.mrf.mxu0 }
  0xb6   :  { %v183_v20 = vpop.f32.mrf.mxu0 }
  0xb7   :  { %v217_v21 = vpack.c.bf16 %v183_v20, %v181_v19 }
  0xbe   :  { %v186_v22 = vpop.f32.mrf.mxu0 }
  0xc6   :  { %v188_v23 = vpop.f32.mrf.mxu0 }
  0xc7   :  { %v218_v24 = vpack.c.bf16 %v188_v23, %v186_v22 }
  0xce   :  { %v191_v25 = vpop.f32.mrf.mxu0 }
  0xd6   :  { %v193_v26 = vpop.f32.mrf.mxu0 }
  0xd7   :  { %v219_v27 = vpack.c.bf16 %v193_v26, %v191_v25 }
  0xde   :  { %v196_v28 = vpop.f32.mrf.mxu0 }
  0xe6   :  { %v198_v29 = vpop.f32.mrf.mxu0 }
  0xe7   :  { %v220_v39 = vpack.c.bf16 %v198_v29, %v196_v28 }
  0xee   :  { %v201_v30 = vpop.f32.mrf.mxu0 }
  0xf6   :  { %v203_v31 = vpop.f32.mrf.mxu0 }
  0xf7   :  { %v221_v38 = vpack.c.bf16 %v203_v31, %v201_v30 }
  0xfe   :  { %v206_v32 = vpop.f32.mrf.mxu0 }
 0x106   :  { %v208_v33 = vpop.f32.mrf.mxu0 }
 0x107   :  { %v222_v37 = vpack.c.bf16 %v208_v33, %v206_v32 }
 0x10e   :  { %v211_v34 = vpop.f32.mrf.mxu0 }
 0x116   :  { %v213_v35 = vpop.f32.mrf.mxu0 }
 0x117   :  { %v223_v36 = vpack.c.bf16 %v213_v35, %v211_v34 }
 0x119   :  { %276 = vmatpush.bf16.msra.mxu1 %v223_v36 }
 0x11d   :  { %277 = vmatpush.bf16.msra.mxu1 %v222_v37 }
 0x121   :  { %278 = vmatpush.bf16.msra.mxu1 %v221_v38 }
 0x125   :  { %279 = vmatpush.bf16.msra.mxu1 %v220_v39 }
 0x129   :  { %280 = vmatpush.bf16.msra.mxu1 %v219_v27 }
 0x12d   :  { %281 = vmatpush.bf16.msra.mxu1 %v218_v24 }
 0x131   :  { %282 = vmatpush.bf16.msra.mxu1 %v217_v21 }
 0x135   :  { %283 = vmatpush.bf16.msra.mxu1 %v216_v18 }
 0x138   :  { %284 = vmatmul.bf16.vlgmr.msra.gmra.mxu1 %v791_v40 }
 0x148   :  { %289 = vmatmul.bf16.gmra.mxu1 %v797_v41 }
 0x158   :  { %294 = vmatmul.bf16.gmra.mxu1 %v803_v42 }
 0x168   :  { %299 = vmatmul.bf16.gmra.mxu1 %v809_v43 }
 0x178   :  { %304 = vmatmul.bf16.gmra.mxu1 %v815_v44 }
 0x188   :  { %309 = vmatmul.bf16.gmra.mxu1 %v824_v46 }
 0x198   :  { %314 = vmatmul.bf16.gmra.mxu1 %v842_v51 }
 0x1a8   :  { %319 = vmatmul.bf16.gmra.mxu1 %v857_v55 }
 0x1b5   :  { %v285_v56 = vpop.f32.mrf.mxu1 }
 0x1b6   :  { %v286_v58 = vadd.f32 %v703_v57, %v285_v56 }
 0x1b8   :  { %v325_v61 = vmax.f32 %v286_v58, 0.0 }
 0x1bd   :  { %v287_v59 = vpop.f32.mrf.mxu1 }
 0x1be   :  { %v288_v60 = vadd.f32 %v703_v57, %v287_v59 }
 0x1c0   :  { %v326_v62 = vmax.f32 %v288_v60, 0.0 }
 0x1c2   :  { %v341_v63 = vpack.c.bf16 %v326_v62, %v325_v61 }
 0x1c4   :  { %421 = vmatmul.bf16.vlgmr.msra.gmra.mxu2 %v341_v63 }
 0x1c5   :  { %v290_v0 = vpop.f32.mrf.mxu1 }
 0x1c6   :  { %v291_v1 = vadd.f32 %v703_v57, %v290_v0 }
 0x1c8   :  { %v327_v4 = vmax.f32 %v291_v1, 0.0 }
 0x1cd   :  { %v292_v2 = vpop.f32.mrf.mxu1 }
 0x1ce   :  { %v293_v3 = vadd.f32 %v703_v57, %v292_v2 }
 0x1d0   :  { %v328_v5 = vmax.f32 %v293_v3, 0.0 }
 0x1d2   :  { %v342_v6 = vpack.c.bf16 %v328_v5, %v327_v4 }
 0x1d4   :  { %426 = vmatmul.bf16.gmra.mxu2 %v342_v6 }
 0x1d5   :  { %v295_v7 = vpop.f32.mrf.mxu1 }
 0x1d6   :  { %v296_v8 = vadd.f32 %v703_v57, %v295_v7 }
 0x1d8   :  { %v329_v11 = vmax.f32 %v296_v8, 0.0 }
 0x1dd   :  { %v297_v9 = vpop.f32.mrf.mxu1 }
 0x1de   :  { %v298_v10 = vadd.f32 %v703_v57, %v297_v9 }
 0x1e0   :  { %v330_v12 = vmax.f32 %v298_v10, 0.0 }
 0x1e2   :  { %v343_v13 = vpack.c.bf16 %v330_v12, %v329_v11 }
 0x1e4   :  { %431 = vmatmul.bf16.gmra.mxu2 %v343_v13 }
 0x1e5   :  { %v300_v14 = vpop.f32.mrf.mxu1 }
 0x1e6   :  { %v301_v15 = vadd.f32 %v703_v57, %v300_v14 }
 0x1e8   :  { %v331_v18 = vmax.f32 %v301_v15, 0.0 }
 0x1ed   :  { %v302_v16 = vpop.f32.mrf.mxu1 }
 0x1ee   :  { %v303_v17 = vadd.f32 %v703_v57, %v302_v16 }
 0x1f0   :  { %v332_v19 = vmax.f32 %v303_v17, 0.0  ;;  %v704_v17 = vld [vmem:[%s927_s5] ss:$0 sm:$0xff] }
 0x1f2   :  { %v344_v20 = vpack.c.bf16 %v332_v19, %v331_v18 }
 0x1f4   :  { %436 = vmatmul.bf16.gmra.mxu2 %v344_v20 }
 0x1f5   :  { %v305_v21 = vpop.f32.mrf.mxu1 }
 0x1f6   :  { %v306_v22 = vadd.f32 %v703_v57, %v305_v21 }
 0x1f8   :  { %v333_v25 = vmax.f32 %v306_v22, 0.0 }
 0x1fd   :  { %v307_v23 = vpop.f32.mrf.mxu1 }
 0x1fe   :  { %v308_v24 = vadd.f32 %v703_v57, %v307_v23 }
 0x200   :  { %v334_v26 = vmax.f32 %v308_v24, 0.0 }
 0x202   :  { %v345_v27 = vpack.c.bf16 %v334_v26, %v333_v25 }
 0x204   :  { %441 = vmatmul.bf16.gmra.mxu2 %v345_v27 }
 0x205   :  { %v310_v28 = vpop.f32.mrf.mxu1 }
 0x206   :  { %v311_v29 = vadd.f32 %v703_v57, %v310_v28 }
 0x208   :  { %v335_v32 = vmax.f32 %v311_v29, 0.0 }
 0x20d   :  { %v312_v30 = vpop.f32.mrf.mxu1 }
 0x20e   :  { %v313_v31 = vadd.f32 %v703_v57, %v312_v30 }
 0x210   :  { %v336_v33 = vmax.f32 %v313_v31, 0.0 }
 0x212   :  { %v346_v34 = vpack.c.bf16 %v336_v33, %v335_v32 }
 0x214   :  { %446 = vmatmul.bf16.gmra.mxu2 %v346_v34 }
 0x215   :  { %v315_v35 = vpop.f32.mrf.mxu1 }
 0x216   :  { %v316_v36 = vadd.f32 %v703_v57, %v315_v35 }
 0x218   :  { %v337_v39 = vmax.f32 %v316_v36, 0.0 }
 0x21d   :  { %v317_v37 = vpop.f32.mrf.mxu1 }
 0x21e   :  { %v318_v38 = vadd.f32 %v703_v57, %v317_v37 }
 0x220   :  { %v338_v45 = vmax.f32 %v318_v38, 0.0 }
 0x222   :  { %v347_v47 = vpack.c.bf16 %v338_v45, %v337_v39 }
 0x224   :  { %451 = vmatmul.bf16.gmra.mxu2 %v347_v47 }
 0x225   :  { %v320_v48 = vpop.f32.mrf.mxu1 }
 0x226   :  { %v321_v49 = vadd.f32 %v703_v57, %v320_v48 }
 0x228   :  { %v339_v53 = vmax.f32 %v321_v49, 0.0 }
 0x22d   :  { %v322_v50 = vpop.f32.mrf.mxu1 }
 0x22e   :  { %v323_v52 = vadd.f32 %v703_v57, %v322_v50 }
 0x230   :  { %v340_v54 = vmax.f32 %v323_v52, 0.0 }
 0x232   :  { %v348_v56 = vpack.c.bf16 %v340_v54, %v339_v53 }
 0x234   :  { %456 = vmatmul.bf16.gmra.mxu2 %v348_v56 }
 0x247   :  { %v422_v58 = vpop.f32.mrf.mxu2 }
 0x24f   :  { %v424_v59 = vpop.f32.mrf.mxu2 }
 0x250   :  { %v462_v60 = vpack.c.bf16 %v424_v59, %v422_v58 }
 0x257   :  { %v427_v61 = vpop.f32.mrf.mxu2 }
 0x25f   :  { %v429_v62 = vpop.f32.mrf.mxu2 }
 0x260   :  { %v463_v63 = vpack.c.bf16 %v429_v62, %v427_v61 }
 0x267   :  { %v432_v0 = vpop.f32.mrf.mxu2 }
 0x26f   :  { %v434_v1 = vpop.f32.mrf.mxu2 }
 0x270   :  { %v464_v2 = vpack.c.bf16 %v434_v1, %v432_v0 }
 0x277   :  { %v437_v3 = vpop.f32.mrf.mxu2 }
 0x27f   :  { %v439_v4 = vpop.f32.mrf.mxu2 }
 0x280   :  { %v465_v5 = vpack.c.bf16 %v439_v4, %v437_v3 }
 0x287   :  { %v442_v6 = vpop.f32.mrf.mxu2 }
 0x28f   :  { %v444_v7 = vpop.f32.mrf.mxu2 }
 0x290   :  { %v466_v16 = vpack.c.bf16 %v444_v7, %v442_v6 }
 0x297   :  { %v447_v8 = vpop.f32.mrf.mxu2 }
 0x29f   :  { %v449_v57 = vpop.f32.mrf.mxu2 }
 0x2a0   :  { %v467_v15 = vpack.c.bf16 %v449_v57, %v447_v8 }
 0x2a7   :  { %v452_v9 = vpop.f32.mrf.mxu2 }
 0x2af   :  { %v454_v10 = vpop.f32.mrf.mxu2 }
 0x2b0   :  { %v468_v14 = vpack.c.bf16 %v454_v10, %v452_v9 }
 0x2b7   :  { %v457_v11 = vpop.f32.mrf.mxu2 }
 0x2bf   :  { %v459_v12 = vpop.f32.mrf.mxu2 }
 0x2c0   :  { %v469_v13 = vpack.c.bf16 %v459_v12, %v457_v11 }
 0x2c2   :  { %474 = vmatpush.bf16.msra.mxu3 %v469_v13 }
 0x2c6   :  { %475 = vmatpush.bf16.msra.mxu3 %v468_v14 }
 0x2ca   :  { %476 = vmatpush.bf16.msra.mxu3 %v467_v15 }
 0x2ce   :  { %477 = vmatpush.bf16.msra.mxu3 %v466_v16 }
 0x2d2   :  { %478 = vmatpush.bf16.msra.mxu3 %v465_v5 }
 0x2d6   :  { %479 = vmatpush.bf16.msra.mxu3 %v464_v2 }
 0x2da   :  { %480 = vmatpush.bf16.msra.mxu3 %v463_v63 }
 0x2de   :  { %481 = vmatpush.bf16.msra.mxu3 %v462_v60 }
 0x2e1   :  { %482 = vmatmul.bf16.vlgmr.msra.gmra.mxu3 %v791_v40 }
 0x2f1   :  { %487 = vmatmul.bf16.gmra.mxu3 %v797_v41 }
 0x301   :  { %492 = vmatmul.bf16.gmra.mxu3 %v803_v42 }
 0x311   :  { %497 = vmatmul.bf16.gmra.mxu3 %v809_v43 }
 0x321   :  { %502 = vmatmul.bf16.gmra.mxu3 %v815_v44 }
 0x331   :  { %507 = vmatmul.bf16.gmra.mxu3 %v824_v46 }
 0x341   :  { %512 = vmatmul.bf16.gmra.mxu3 %v842_v51 }
 0x351   :  { %517 = vmatmul.bf16.gmra.mxu3 %v857_v55 }
 0x364   :  { %v483_v18 = vpop.f32.mrf.mxu3 }
 0x365   :  { %v484_v40 = vadd.f32 %v704_v17, %v483_v18 }
 0x367   :  { %523 = vst [vmem:[%s928_s6] sm:$0xff] %v484_v40 }
 0x36c   :  { %v485_v41 = vpop.f32.mrf.mxu3 }
 0x36d   :  { %v486_v42 = vadd.f32 %v704_v17, %v485_v41 }
 0x36f   :  { %524 = vst [vmem:[%s928_s6 + $0x8] sm:$0xff] %v486_v42 }
 0x374   :  { %v488_v43 = vpop.f32.mrf.mxu3 }
 0x375   :  { %v489_v44 = vadd.f32 %v704_v17, %v488_v43 }
 0x377   :  { %525 = vst [vmem:[%s928_s6 + $0x10] sm:$0xff] %v489_v44 }
 0x37c   :  { %v490_v46 = vpop.f32.mrf.mxu3 }
 0x37d   :  { %v491_v51 = vadd.f32 %v704_v17, %v490_v46 }
 0x37f   :  { %526 = vst [vmem:[%s928_s6 + $0x18] sm:$0xff] %v491_v51 }
 0x384   :  { %v493_v55 = vpop.f32.mrf.mxu3 }
 0x385   :  { %v494_v19 = vadd.f32 %v704_v17, %v493_v55 }
 0x387   :  { %527 = vst [vmem:[%s928_s6 + $0x20] sm:$0xff] %v494_v19 }
 0x38c   :  { %v495_v20 = vpop.f32.mrf.mxu3 }
 0x38d   :  { %v496_v21 = vadd.f32 %v704_v17, %v495_v20 }
 0x38f   :  { %528 = vst [vmem:[%s928_s6 + $0x28] sm:$0xff] %v496_v21 }
 0x394   :  { %v498_v22 = vpop.f32.mrf.mxu3 }
 0x395   :  { %v499_v23 = vadd.f32 %v704_v17, %v498_v22 }
 0x397   :  { %529 = vst [vmem:[%s928_s6 + $0x30] sm:$0xff] %v499_v23 }
 0x39c   :  { %v500_v24 = vpop.f32.mrf.mxu3 }
 0x39d   :  { %v501_v25 = vadd.f32 %v704_v17, %v500_v24 }
 0x39f   :  { %530 = vst [vmem:[%s928_s6 + $0x38] sm:$0xff] %v501_v25 }
 0x3a4   :  { %v503_v26 = vpop.f32.mrf.mxu3 }
 0x3a5   :  { %v504_v27 = vadd.f32 %v704_v17, %v503_v26 }
 0x3a7   :  { %531 = vst [vmem:[%s928_s6 + $0x40] sm:$0xff] %v504_v27 }
 0x3ac   :  { %v505_v28 = vpop.f32.mrf.mxu3 }
 0x3ad   :  { %v506_v29 = vadd.f32 %v704_v17, %v505_v28 }
 0x3af   :  { %532 = vst [vmem:[%s928_s6 + $0x48] sm:$0xff] %v506_v29 }
 0x3b4   :  { %v508_v30 = vpop.f32.mrf.mxu3 }
 0x3b5   :  { %v509_v31 = vadd.f32 %v704_v17, %v508_v30 }
 0x3b7   :  { %533 = vst [vmem:[%s928_s6 + $0x50] sm:$0xff] %v509_v31 }
 0x3bc   :  { %v510_v32 = vpop.f32.mrf.mxu3 }
 0x3bd   :  { %v511_v33 = vadd.f32 %v704_v17, %v510_v32 }
 0x3bf   :  { %534 = vst [vmem:[%s928_s6 + $0x58] sm:$0xff] %v511_v33 }
 0x3c4   :  { %v513_v34 = vpop.f32.mrf.mxu3 }
 0x3c5   :  { %v514_v35 = vadd.f32 %v704_v17, %v513_v34 }
 0x3c7   :  { %535 = vst [vmem:[%s928_s6 + $0x60] sm:$0xff] %v514_v35 }
 0x3cc   :  { %v515_v36 = vpop.f32.mrf.mxu3 }
 0x3cd   :  { %v516_v37 = vadd.f32 %v704_v17, %v515_v36 }
 0x3cf   :  { %536 = vst [vmem:[%s928_s6 + $0x68] sm:$0xff] %v516_v37 }
 0x3d4   :  { %v518_v38 = vpop.f32.mrf.mxu3 }
 0x3d5   :  { %v519_v39 = vadd.f32 %v704_v17, %v518_v38 }
 0x3d7   :  { %537 = vst [vmem:[%s928_s6 + $0x70] sm:$0xff] %v519_v39 }
 0x3dc   :  { %v520_v45 = vpop.f32.mrf.mxu3 }
 0x3dd   :  { %v521_v47 = vadd.f32 %v704_v17, %v520_v45 }
 0x3df   :  { %538 = vst [vmem:[%s928_s6 + $0x78] sm:$0xff] %v521_v47 }

</bundles_post_ra>
